<compile_context>
chip_gen: v5e
topology: v5e:2x2
jax: 0.10.0
libtpu: 0.0.40
codegen_flags: <defaults>
</compile_context>

<pallas_src>
import math
import functools

import jax
import jax.numpy as jnp
from jax import lax
from jax.experimental import pallas as pl
from jax.experimental.pallas import tpu as pltpu


# Fits comfortably under v5e/v6e (128 MiB) and v7x (64 MiB per TC) VMEM.
_VMEM_LIMIT_BYTES = 48 * 1024 * 1024


def _choose_tile(dim, candidates):
    """Largest candidate that evenly divides dim, else the full dim."""
    for c in candidates:
        if dim % c == 0:
            return c
    # TODO(synk): pad (instead of falling back to the full dim) for large,
    # non-divisible sizes — full-dim blocks can exceed VMEM on v7x.
    return dim


# ---------------------------------------------------------------------------
# Kernel 1: Conv1D ( == addmm: bias + x @ W ), the GPT-2 "conv" projection.
# Tiled over (M, N); K stays un-tiled (fits VMEM for GPT-2 hidden sizes).
# ---------------------------------------------------------------------------
def _linear_kernel(x_ref, w_ref, b_ref, o_ref):
    acc = jnp.dot(x_ref[...], w_ref[...], preferred_element_type=jnp.float32)
    o_ref[...] = (acc + b_ref[...]).astype(o_ref.dtype)


def conv1d(x2d, w, b, compute_dtype=jnp.bfloat16):
    """x2d: (M, K), w: (K, N), b: (N,) -> (M, N) in x2d.dtype."""
    M, K = x2d.shape
    N = w.shape[1]
    out_dtype = x2d.dtype

    # bf16 inputs -> bf16 MXU path + halved HBM/VMEM bytes; f32 accumulate.
    xc = x2d.astype(compute_dtype)
    wc = w.astype(compute_dtype)
    bc = b.astype(jnp.float32).reshape(1, N)

    # Large M tile: weight HBM re-reads scale as (M/tm); a (1024, K) bf16
    # x block is ~1.5 MB for GPT-2 and double-buffers easily.
    tm = _choose_tile(M, (1024, 512, 256, 128, 64, 32, 16, 8))
    tn = _choose_tile(N, (512, 384, 256, 128))
    # TODO(synk): for very large K add a K grid axis marked "arbitrary" with an
    # f32 VMEM accumulator and pl.when init/finalize (K fits VMEM for GPT-2).
    return pl.pallas_call(
        _linear_kernel,
        out_shape=jax.ShapeDtypeStruct((M, N), out_dtype),
        grid=(M // tm, N // tn),
        in_specs=[
            pl.BlockSpec((tm, K), lambda i, j: (i, 0)),
            pl.BlockSpec((K, tn), lambda i, j: (0, j)),
            pl.BlockSpec((1, tn), lambda i, j: (0, j)),
        ],
        out_specs=pl.BlockSpec((tm, tn), lambda i, j: (i, j)),
        compiler_params=pltpu.CompilerParams(
            dimension_semantics=("parallel", "parallel"),
            vmem_limit_bytes=_VMEM_LIMIT_BYTES),
    )(xc, wc, bc)


# ---------------------------------------------------------------------------
# Kernel 2: flash-style causal attention over all heads of one batch element.
# Grid: (B, T//tq, T//tkv), kv axis last + "arbitrary" (online softmax).
# ---------------------------------------------------------------------------
def _flash_attn_kernel(q_ref, k_ref, v_ref, o_ref,
                       m_sc, l_sc, acc_sc,
                       *, tq, tkv, n_head, head_dim):
    qi = pl.program_id(1)
    ki = pl.program_id(2)

    @pl.when(ki == 0)
    def _init():
        m_sc[...] = jnp.full(m_sc.shape, -jnp.inf, m_sc.dtype)
        l_sc[...] = jnp.zeros(l_sc.shape, l_sc.dtype)
        acc_sc[...] = jnp.zeros(acc_sc.shape, acc_sc.dtype)

    q_start = qi * tq
    k_start = ki * tkv

    def _scores():
        # bf16 MXU matmul, f32 accumulate; contraction over hd (K is not
        # pre-transposed).  (H, tq, tkv) f32.
        return jnp.einsum('hqd,hkd->hqk', q_ref[...], k_ref[...],
                          preferred_element_type=jnp.float32)

    def _online_softmax_update(s):
        # All softmax state and VPU/EUP math stays in f32 (v5e has no bf16
        # VALU/EUP); only the PV matmul inputs are cast to bf16.
        v = v_ref[...]
        m_prev = m_sc[...]                                # (H, tq, 1)
        m_new = jnp.maximum(m_prev, jnp.max(s, axis=-1, keepdims=True))
        alpha = jnp.exp(m_prev - m_new)
        p = jnp.exp(s - m_new)
        l_sc[...] = alpha * l_sc[...] + jnp.sum(p, axis=-1, keepdims=True)
        acc_sc[...] = alpha * acc_sc[...] + jnp.einsum(
            'hqk,hkd->hqd', p.astype(v.dtype), v,
            preferred_element_type=jnp.float32)
        m_sc[...] = m_new

    # Tiles fully below the diagonal: no iota / compare / select at all.
    @pl.when(k_start + (tkv - 1) <= q_start)
    def _full_tile():
        _online_softmax_update(_scores())

    # Tiles crossing the diagonal: single-select causal mask (matches the
    # reference's  w*b - 1e10*(1-b)  semantics).
    @pl.when(jnp.logical_and(k_start + (tkv - 1) > q_start,
                             k_start <= q_start + (tq - 1)))
    def _diag_tile():
        s = _scores()
        row = q_start + lax.broadcasted_iota(jnp.int32, (1, tq, tkv), 1)
        col = k_start + lax.broadcasted_iota(jnp.int32, (1, tq, tkv), 2)
        _online_softmax_update(jnp.where(col <= row, s, -1e10))

    # Fully-masked tiles (k_start > q_start + tq - 1) do no compute; their
    # K/V DMAs are also elided via the clamped index_map in attn_core.

    @pl.when(ki == pl.num_programs(2) - 1)
    def _finalize():
        # Deferred normalization; approx reciprocal routes to the EUP slot.
        inv = pl.reciprocal(l_sc[...], approx=True)       # (H, tq, 1)
        out = acc_sc[...] * inv                           # (H, tq, hd) f32
        # Lane-dense (tq, C) store; fuses merge_heads.
        # TODO(synk): replace the per-head concat with a single fused relayout
        # (e.g. pltpu.einshape) once verified to lower on all generations.
        merged = jnp.concatenate([out[h] for h in range(n_head)], axis=-1)
        o_ref[...] = merged.astype(o_ref.dtype)


def attn_core(q, k, v, compute_dtype=jnp.bfloat16):
    """q, k, v: (B, H, T, hd) -> (B, T, H*hd) with heads already merged."""
    B, H, T, hd = q.shape
    C = H * hd
    out_dtype = q.dtype

    # bf16 at the pallas_call boundary (halves q/k/v HBM + VMEM bytes, enables
    # the bf16 MXU); all f32 accumulation stays inside the kernel.
    q = q.astype(compute_dtype)
    k = k.astype(compute_dtype)
    v = v.astype(compute_dtype)

    # tq <= 128 / tkv <= 256 keeps the f32 score/p temporaries small enough
    # for v7x's 64 MiB VMEM per TC and friendly to v5e's single vst slot.
    tq = _choose_tile(T, (128, 64, 32, 16, 8))
    tkv = _choose_tile(T, (256, 128, 64, 32, 16, 8))

    # Clamp the kv block index so fully-masked (above-diagonal) tiles re-use
    # the previous block -> Pallas elides the DMA (~halves K/V HBM traffic).
    def kv_index_map(b, i, j):
        j_clamped = jnp.minimum(j, (i * tq + (tq - 1)) // tkv)
        return (b, 0, j_clamped, 0)

    kern = functools.partial(_flash_attn_kernel, tq=tq, tkv=tkv,
                             n_head=H, head_dim=hd)
    return pl.pallas_call(
        kern,
        out_shape=jax.ShapeDtypeStruct((B, T, C), out_dtype),
        grid_spec=pltpu.PrefetchScalarGridSpec(
            num_scalar_prefetch=0,
            grid=(B, T // tq, T // tkv),
            in_specs=[
                pl.BlockSpec((None, H, tq, hd), lambda b, i, j: (b, 0, i, 0)),
                pl.BlockSpec((None, H, tkv, hd), kv_index_map),
                pl.BlockSpec((None, H, tkv, hd), kv_index_map),
            ],
            out_specs=pl.BlockSpec((None, tq, C), lambda b, i, j: (b, i, 0)),
            scratch_shapes=[
                pltpu.VMEM((H, tq, 1), jnp.float32),    # running max m
                pltpu.VMEM((H, tq, 1), jnp.float32),    # running denom l
                pltpu.VMEM((H, tq, hd), jnp.float32),   # unnormalized acc
            ]),
        compiler_params=pltpu.CompilerParams(
            dimension_semantics=("parallel", "parallel", "arbitrary"),
            vmem_limit_bytes=_VMEM_LIMIT_BYTES),
    )(q, k, v)


# ---------------------------------------------------------------------------
# Full Attention.forward (layer_past=None path). Glue stays in plain JAX.
# ---------------------------------------------------------------------------
def attention_forward(x, params, n_head, scale=False,
                      compute_dtype=jnp.bfloat16):
    B, T, C = x.shape
    w_attn, b_attn, w_proj, b_proj = params
    hd = C // n_head

    # Fold 1/sqrt(head_dim) into the q columns of the c_attn projection:
    # mathematically identical to scaling the scores, zero per-step cost.
    if scale:
        s = 1.0 / math.sqrt(hd)
        w_attn = w_attn.at[:, :C].multiply(s)
        b_attn = b_attn.at[:C].multiply(s)

    # c_attn
    h = conv1d(x.reshape(B * T, C), w_attn, b_attn,
               compute_dtype=compute_dtype).reshape(B, T, 3 * C)
    q, k, v = jnp.split(h, 3, axis=2)

    def split_heads(t):
        return jnp.transpose(t.reshape(B, T, n_head, hd), (0, 2, 1, 3))

    # TODO(synk): q's split_heads transpose could be fused into the attention
    # kernel by reading a (tq, C) slab of `h` and relayouting once per q-tile.
    q = split_heads(q)        # (B, H, T, hd)
    key = split_heads(k)      # (B, H, T, hd) -- no pre-transpose; the kernel
    value = split_heads(v)    #                  contracts over hd directly.

    # torch: present = stack((key(B,H,hd,T).transpose(-2,-1), value))
    #              == stack(((B,H,T,hd) key, value)) since K is untransposed.
    present = jnp.stack((key, value))

    # Attention (flash kernel outputs merged heads: (B, T, C)).
    a = attn_core(q, key, value, compute_dtype=compute_dtype)

    # c_proj
    a = conv1d(a.reshape(B * T, C), w_proj, b_proj,
               compute_dtype=compute_dtype).reshape(B, T, C)
    return a, present


# ---------------------------------------------------------------------------
# Pure-JAX reference for verification (same bf16 matmul inputs, original
# module semantics: scores scaled, full softmax, f32 everywhere else).
# ---------------------------------------------------------------------------
def attention_reference(x, params, n_head, scale=False,
                        compute_dtype=jnp.bfloat16):
    B, T, C = x.shape
    w_attn, b_attn, w_proj, b_proj = params
    hd = C // n_head

    def ref_conv1d(x2d, w, bias):
        return jnp.dot(x2d.astype(compute_dtype), w.astype(compute_dtype),
                       preferred_element_type=jnp.float32) + bias

    h = ref_conv1d(x.reshape(B * T, C), w_attn, b_attn).reshape(B, T, 3 * C)
    q, k, v = jnp.split(h, 3, axis=2)

    q = jnp.transpose(q.reshape(B, T, n_head, hd), (0, 2, 1, 3))
    key = jnp.transpose(k.reshape(B, T, n_head, hd), (0, 2, 1, 3))
    value = jnp.transpose(v.reshape(B, T, n_head, hd), (0, 2, 1, 3))
    present = jnp.stack((key, value))

    w = jnp.einsum('bhqd,bhkd->bhqk', q.astype(compute_dtype),
                   key.astype(compute_dtype),
                   preferred_element_type=jnp.float32)
    if scale:
        w = w / math.sqrt(hd)
    b = jnp.tril(jnp.ones((T, T), jnp.float32))[None, None]
    w = w * b - 1e10 * (1.0 - b)
    w = jax.nn.softmax(w, axis=-1)
    a = jnp.einsum('bhqk,bhkd->bhqd', w.astype(compute_dtype),
                   value.astype(compute_dtype),
                   preferred_element_type=jnp.float32)
    a = jnp.transpose(a, (0, 2, 1, 3)).reshape(B * T, C)
    a = ref_conv1d(a, w_proj, b_proj).reshape(B, T, C)
    return a, present


if __name__ == "__main__":
    # Small shapes consistent with the module: nx = 32, n_head = 4, n_ctx = 8.
    B, T, C, n_head = 2, 8, 32, 4
    scale = True

    key = jax.random.PRNGKey(0)
    k_x, k_wa, k_wp = jax.random.split(key, 3)

    x = jax.random.normal(k_x, (B, T, C), dtype=jnp.float32)

    # Conv1D init: weight ~ N(0, 0.02), bias = 0 (deterministic, in-script).
    w_attn = 0.02 * jax.random.normal(k_wa, (C, 3 * C), dtype=jnp.float32)
    b_attn = jnp.zeros((3 * C,), dtype=jnp.float32)
    w_proj = 0.02 * jax.random.normal(k_wp, (C, C), dtype=jnp.float32)
    b_proj = jnp.zeros((C,), dtype=jnp.float32)
    params = (w_attn, b_attn, w_proj, b_proj)

    a, present = attention_forward(x, params, n_head, scale=scale)
    a = jax.block_until_ready(a)
    present = jax.block_until_ready(present)

    a_ref, present_ref = attention_reference(x, params, n_head, scale=scale)

    assert a.shape == (B, T, C)
    assert present.shape == (2, B, n_head, T, C // n_head)
    assert jnp.allclose(present, present_ref, atol=1e-4, rtol=1e-4), \
        float(jnp.max(jnp.abs(present - present_ref)))
    # Kernel and reference share the same bf16 matmul inputs; remaining diffs
    # are online-vs-full softmax ordering, the folded q scale, and the approx
    # reciprocal — all well inside these tolerances.
    assert jnp.allclose(a, a_ref, atol=1e-3, rtol=2e-2), \
        float(jnp.max(jnp.abs(a - a_ref)))

    print("KERNEL_OK")
</pallas_src>

<mosaic_0001>
module attributes {stable_mosaic.version = 11 : i64} {
  func.func @_linear_kernel(%arg0: i32, %arg1: i32, %arg2: memref<16x32xbf16, #tpu.memory_space<vmem>>, %arg3: memref<32x96xbf16, #tpu.memory_space<vmem>>, %arg4: memref<1x96xf32, #tpu.memory_space<vmem>>, %arg5: memref<16x96xf32, #tpu.memory_space<vmem>>) attributes {dimension_semantics = [#tpu.dimension_semantics<parallel>, #tpu.dimension_semantics<parallel>], iteration_bounds = array<i64: 1, 1>, scalar_prefetch = 0 : i64, scratch_operands = 0 : i64, tpu.core_type = #tpu.core_type<tc>, window_params = [{transform_indices = @transform_0, window_bounds = array<i64: 16, 32>}, {transform_indices = @transform_1, window_bounds = array<i64: 32, 96>}, {transform_indices = @transform_2, window_bounds = array<i64: 1, 96>}, {transform_indices = @transform_3, window_bounds = array<i64: 16, 96>}]} {
    %c0 = arith.constant 0 : index
    %c0_0 = arith.constant 0 : index
    %0 = vector.load %arg2[%c0, %c0_0] : memref<16x32xbf16, #tpu.memory_space<vmem>>, vector<16x32xbf16>
    %c0_1 = arith.constant 0 : index
    %c0_2 = arith.constant 0 : index
    %1 = vector.load %arg3[%c0_1, %c0_2] : memref<32x96xbf16, #tpu.memory_space<vmem>>, vector<32x96xbf16>
    %cst = arith.constant dense<0.000000e+00> : vector<16x96xf32>
    %2 = tpu.matmul %0, %1, %cst {dimension_numbers = #tpu.dot_dimension_numbers<[1], [0], [0], [1], [0, 0, 1, 1], [], []>} : vector<16x32xbf16>, vector<32x96xbf16>, vector<16x96xf32> -> vector<16x96xf32>
    %c0_3 = arith.constant 0 : index
    %c0_4 = arith.constant 0 : index
    %3 = vector.load %arg4[%c0_3, %c0_4] : memref<1x96xf32, #tpu.memory_space<vmem>>, vector<1x96xf32>
    %4 = vector.broadcast %3 : vector<1x96xf32> to vector<16x96xf32>
    %5 = arith.addf %2, %4 : vector<16x96xf32>
    %c0_5 = arith.constant 0 : index
    %c0_6 = arith.constant 0 : index
    %6 = vector.load %arg5[%c0_5, %c0_6] : memref<16x96xf32, #tpu.memory_space<vmem>>, vector<16x96xf32>
    tpu.vector_store %arg5[%c0_5, %c0_6], %5 {strides = array<i32>} : memref<16x96xf32, #tpu.memory_space<vmem>>, vector<16x96xf32>,
    return
  }
  func.func @transform_0(%arg0: i32, %arg1: i32) -> (i32, i32) {
    %c0_i32 = arith.constant 0 : i32
    %c0_i32_0 = arith.constant 0 : i32
    return %arg0, %c0_i32 : i32, i32
  }
  func.func @transform_1(%arg0: i32, %arg1: i32) -> (i32, i32) {
    %c0_i32 = arith.constant 0 : i32
    %c0_i32_0 = arith.constant 0 : i32
    return %c0_i32, %arg1 : i32, i32
  }
  func.func @transform_2(%arg0: i32, %arg1: i32) -> (i32, i32) {
    %c0_i32 = arith.constant 0 : i32
    %c0_i32_0 = arith.constant 0 : i32
    return %c0_i32, %arg1 : i32, i32
  }
  func.func @transform_3(%arg0: i32, %arg1: i32) -> (i32, i32) {
    %c0_i32 = arith.constant 0 : i32
    return %arg0, %arg1 : i32, i32
  }
}

</mosaic_0001>

<bundles_post_ra>
// kernel: tpu_custom_call.1
= control target key start
LH: loop header
LB: loop body
LE: loop exit
PB: predicated region body
PF: predicated region fallthrough
CT: control target
= control target key end

     0   :  { %8 = vsyncpa [#allocation3], 0  ;;  %s257_s0 = inlined_call_operand.hbm [shape: bf16[16,32], index: 0, kind: input, shape index: {}]   ;;  %s258_s1 = inlined_call_operand.hbm [shape: bf16[32,96], index: 1, kind: input, shape index: {}]   ;;  %s259_s2 = inlined_call_operand.vmem [shape: f32[1,96], index: 2, kind: input, shape index: {}]   ;;  %s260_s3 = inlined_call_operand.hbm [shape: f32[16,96], index: 3, kind: output, shape index: {}]  }
   0x1   :  { %9 = vsyncpa [#allocation6], 0 }
   0x2   :  { %10 = vsyncpa [#allocation4], 0  ;;  %s15_s14 = sshll.u32 %s257_s0, 4  ;;  %s218_s15 = smov [#allocation2]   ;;  %s16_s14 = int_to_ptr.hbm [resolvable:$true] %s15_s14 }
   0x3   :  { %s17_s16 = sshll.u32 %s218_s15, 4  ;;  %s28_s19 = sshll.u32 %s258_s1, 4  ;;  %s18_s16 = int_to_ptr.vmem [resolvable:$true] %s17_s16  ;;  %s29_s19 = int_to_ptr.hbm [resolvable:$true] %s28_s19 }
   0x4   :  { %s219_s20 = smov 64   ;;  %s220_s21 = smov 4  }
   0x5   :  { %23 = dma.hbm_to_vmem [thread:$0]  %s16_s14, 128, %s18_s16, [#allocation3], %s219_s20, %s219_s20, %s220_s21  }
   0x6   :  { %s221_s22 = smov [#allocation5]  }
   0x7   :  { %s30_s23 = sshll.u32 %s221_s22, 4  ;;  %s31_s23 = int_to_ptr.vmem [resolvable:$true] %s30_s23 }
   0x8   :  { %36 = dma.hbm_to_vmem [thread:$0]  %s29_s19, 256, %s31_s23, [#allocation6], %s219_s20, %s219_s20, %s220_s21  }
   0x9   :  { %212 = dma.done.wait [#allocation3], 128  }
   0xa   :  { %213 = vsyncadd [#allocation3], 4294967168 }
   0xb   :  { %214 = dma.done.wait [#allocation6], 256  }
   0xc   :  { %215 = vsyncadd [#allocation6], 4294967040  ;;  %v131_v0 = vld [vmem:[#allocation5 + $0x8] sm:$0xff]  ;;  %v130_v1 = vld [vmem:[#allocation5] sm:$0xff]  ;;  %vm75_vm0 = vcmask 261120   ;;  %vm93_vm1 = vcmask 785408  }
   0xd   :  { %85 = vmatpush.bf16.msra.mxu0 %v131_v0  ;;  %v129_v2 = vld [vmem:[#allocation2] sm:$0xff]  ;;  %s222_s24 = smov [#allocation7]   ;;  %s102_s28 = sshll.u32 %s260_s3, 4  ;;  %s103_s28 = int_to_ptr.hbm [resolvable:$true] %s102_s28 }
   0xe   :  { %v139_v3 = vld [vmem:[%s259_s2] ss:$0 sm:$0xff]  ;;  %s100_s25 = sshll.u32 %s222_s24, 4  ;;  %s223_s29 = smov 128   ;;  %s101_s25 = int_to_ptr.vmem [resolvable:$true] %s100_s25 }
   0xf   :  { %s224_s30 = smov 8  }
  0x11   :  { %86 = vmatpush.bf16.msra.mxu0 %v130_v1 }
  0x14   :  { %128 = vmatmul.msk.bf16.vlgmr.msra.gmra.mxu0 %vm75_vm0, %v129_v2 }
  0x91   :  { %v88_v4 = vpop.f32.mrf.mxu0 }
  0x92   :  { %v89_v5 = vadd.f32 %v139_v3, %v88_v4 }
  0x94   :  { %94 = vst.msk [vmem:[#allocation7] sm:$0xff] %vm93_vm1, %v89_v5 }
  0x99   :  { %v90_v6 = vpop.f32.mrf.mxu0 }
  0x9a   :  { %v91_v7 = vadd.f32 %v139_v3, %v90_v6 }
  0x9c   :  { %95 = vst.msk [vmem:[#allocation7 + $0x8] sm:$0xff] %vm93_vm1, %v91_v7 }
  0x9d   :  { %108 = dma.vmem_to_hbm [thread:$0]  %s101_s25, 256, %s103_s28, [#allocation4], %s223_s29, %s223_s29, %s224_s30  }
  0x9e   :  { %216 = dma.done.wait [#allocation4], 256  }
  0x9f   :  { %217 = vsyncadd [#allocation4], 4294967040 }
  0xa0   :  { %113 = vsyncpa [#allocation3], 1 }
  0xa1   :  { %114 = vsyncpa [#allocation6], 1 }
  0xa2   :  { %115 = vsyncpa [#allocation4], 1 }

</bundles_post_ra>
